<compile_context>
chip_gen: v6e
topology: v6e:2x2x1
jax: 0.10.0
libtpu: 0.0.40
codegen_flags: <defaults>
</compile_context>

<pallas_src>
import functools

import jax
import jax.numpy as jnp
from jax.experimental import pallas as pl
from jax.experimental.pallas import tpu as pltpu


def _attn_kernel(c1_ref, c2_ref, c3_ref,
                 wq12_ref, wkv_ref, wo_ref, bout_ref,
                 o_ref, *, heads):
    """One grid step handles a block of `bb` batch elements.

    wq12_ref : (D, 2D)        columns = [q1_h0..q1_hH-1 | q2_h0..q2_hH-1], scale folded in
    wkv_ref  : (D, 2D)        columns = [k_h0..k_hH-1  | v_h0..v_hH-1]   (shared by branches)
    wo_ref   : (2*heads, hd, D)  to_out weight rows regrouped per (branch, head)
    bout_ref : (1, D)
    """
    bb, n, d = c3_ref.shape
    hd = d // heads
    m = bb * n
    mxu_dtype = c3_ref.dtype                 # bf16 inputs -> bf16 MXU, f32 accumulation

    # ---- fused Q projection for BOTH branches (scale already folded into weights) ----
    x3 = c3_ref[...].reshape(m, d)
    q12 = jnp.dot(x3, wq12_ref[...],
                  preferred_element_type=jnp.float32).astype(mxu_dtype)   # (m, 2D)

    def head_slice(mat2d, col_block):
        # static lane slice of one head, exposed with a leading per-batch axis
        return mat2d[:, col_block * hd:(col_block + 1) * hd].reshape(bb, n, hd)

    def accum_branch(y, x_ref, branch_idx):
        """Adds this branch's contribution to the output projection accumulator."""
        x = x_ref[...].reshape(m, d)
        # fused K|V projection (the module reuses to_k1/to_v1 for both branches)
        kv = jnp.dot(x, wkv_ref[...],
                     preferred_element_type=jnp.float32).astype(mxu_dtype)  # (m, 2D)

        for h in range(heads):                               # heads is static & small
            q_h = head_slice(q12, branch_idx * heads + h)    # (bb, n, hd)
            k_h = head_slice(kv, h)                          # (bb, n, hd)
            v_h = head_slice(kv, heads + h)                  # (bb, n, hd)

            # scores, batched over the bb batch elements (scale folded into W_q)
            dots = jnp.einsum('bnd,bmd->bnm', q_h, k_h,
                              preferred_element_type=jnp.float32)           # (bb, n, n)
            dots = dots - jnp.max(dots, axis=-1, keepdims=True)
            e = jnp.exp(dots)
            denom = jnp.sum(e, axis=-1, keepdims=True)
            r = pl.reciprocal(denom, approx=True)            # EUP slot
            r = r * (2.0 - denom * r)                        # one Newton step -> f32 accuracy
            p = (e * r).astype(mxu_dtype)

            out_h = jnp.einsum('bnm,bmd->bnd', p, v_h,
                               preferred_element_type=jnp.float32)          # (bb, n, hd)

            # Fold this head straight into the output projection:
            #   y += out_h @ Wout[branch*D + h*hd : branch*D + (h+1)*hd, :]
            w_h = wo_ref[branch_idx * heads + h]             # (hd, D), static index
            y = y + jnp.dot(out_h.reshape(m, hd).astype(mxu_dtype), w_h,
                            preferred_element_type=jnp.float32)
        return y

    y = jnp.zeros((m, d), dtype=jnp.float32)
    y = accum_branch(y, c2_ref, 0)   # branch 1: k1/v1 from c2
    y = accum_branch(y, c1_ref, 1)   # branch 2: k2/v2 from c1 (reusing to_k1/to_v1)
    y = y + bout_ref[...].astype(jnp.float32)                # (1, D) broadcast bias

    o_ref[...] = y.reshape(bb, n, d).astype(o_ref.dtype)


def _pick_batch_block(B, N, D, itemsize, budget_bytes=1 << 20):
    """Largest divisor of B whose (bb, N, D) input block stays under `budget_bytes`."""
    best = 1
    for bb in range(1, B + 1):
        if B % bb == 0 and bb * N * D * itemsize <= budget_bytes:
            best = bb
    return best


def attention_global3(c1, c2, c3, params, heads=2, batch_block=None,
                      vmem_limit_bytes=None):
    B, N, D = c3.shape
    assert c1.shape == (B, N, D) and c2.shape == (B, N, D)
    assert D % heads == 0
    hd = D // heads
    dtype = c3.dtype
    scale = hd ** (-0.5)

    # ---- wrapper-side weight prep (free at trace time) --------------------------
    wq12 = (scale * jnp.concatenate([params["wq1"], params["wq2"]], axis=1)).astype(dtype)
    wkv = jnp.concatenate([params["wk1"], params["wv1"]], axis=1).astype(dtype)
    wo3 = params["wout"].reshape(2 * heads, hd, D).astype(dtype)   # rows grouped per (branch, head)
    bout = params["bout"].reshape(1, D).astype(dtype)

    itemsize = jnp.dtype(dtype).itemsize
    bb = batch_block if batch_block is not None else _pick_batch_block(B, N, D, itemsize)
    assert B % bb == 0, "batch_block must divide B"
    grid = (B // bb,)
    # (on v7x, preferring an even grid length lets megacore split batches across the 2 TCs)

    seq_spec = pl.BlockSpec((bb, N, D), lambda b: (b, 0, 0))

    def _const_spec(shape):
        return pl.BlockSpec(shape, lambda b: (0,) * len(shape))

    if vmem_limit_bytes is None:
        # Rough per-step footprint: double-buffered input/output blocks, resident
        # weights, and the live f32 intermediates of one interleaved branch.
        est = (4 * 2 * bb * N * D * itemsize                    # 3 inputs + 1 output, x2 buffers
               + 2 * (4 * D * D + 2 * D * D + D) * itemsize     # wq12 + wkv + wout + bias, x2
               + 8 * bb * N * D * 4                             # live f32 intermediates
               + 2 * heads * bb * N * N * 4)                    # score matrices
        if est > (16 << 20):                                    # only override when needed
            vmem_limit_bytes = min(est + (4 << 20), 56 << 20)   # stay under v7x's 64 MiB

    kernel = functools.partial(_attn_kernel, heads=heads)
    return pl.pallas_call(
        kernel,
        out_shape=jax.ShapeDtypeStruct((B, N, D), dtype),
        grid=grid,
        in_specs=[
            seq_spec, seq_spec, seq_spec,          # c1, c2, c3
            _const_spec((D, 2 * D)),               # fused Q weight (scale folded in)
            _const_spec((D, 2 * D)),               # fused K|V weight
            _const_spec((2 * heads, hd, D)),       # to_out weight, regrouped per (branch, head)
            _const_spec((1, D)),                   # to_out bias
        ],
        out_specs=seq_spec,
        compiler_params=pltpu.CompilerParams(
            dimension_semantics=("parallel",),
            vmem_limit_bytes=vmem_limit_bytes),
    )(c1, c2, c3, wq12, wkv, wo3, bout)


def reference(c1, c2, c3, params, heads=2):
    """Plain-JAX reference mirroring the PyTorch forward exactly."""
    B, N, D = c3.shape
    hd = D // heads
    scale = hd ** (-0.5)

    def split_heads(x):
        return x.reshape(B, N, heads, hd).transpose(0, 2, 1, 3)   # b h n d

    q1 = split_heads(c3 @ params["wq1"])
    q2 = split_heads(c3 @ params["wq2"])
    k1 = split_heads(c2 @ params["wk1"])
    v1 = split_heads(c2 @ params["wv1"])
    k2 = split_heads(c1 @ params["wk1"])   # forward reuses to_k1
    v2 = split_heads(c1 @ params["wv1"])   # forward reuses to_v1

    def attend(q, k, v):
        dots = jnp.einsum("bhnd,bhmd->bhnm", q, k) * scale
        attn = jax.nn.softmax(dots, axis=-1)
        out = jnp.einsum("bhnm,bhmd->bhnd", attn, v)
        return out.transpose(0, 2, 1, 3).reshape(B, N, D)

    out = jnp.concatenate([attend(q1, k1, v1), attend(q2, k2, v2)], axis=-1)
    return out @ params["wout"] + params["bout"][0]


if __name__ == "__main__":
    B, N, D, heads = 2, 8, 32, 2
    key = jax.random.PRNGKey(0)
    ks = jax.random.split(key, 12)

    c1 = jax.random.normal(ks[0], (B, N, D), jnp.float32)
    c2 = jax.random.normal(ks[1], (B, N, D), jnp.float32)
    c3 = jax.random.normal(ks[2], (B, N, D), jnp.float32)

    s = 0.1
    params = {
        "wq1":  s * jax.random.normal(ks[3], (D, D), jnp.float32),
        "wk1":  s * jax.random.normal(ks[4], (D, D), jnp.float32),
        "wv1":  s * jax.random.normal(ks[5], (D, D), jnp.float32),
        "wq2":  s * jax.random.normal(ks[6], (D, D), jnp.float32),
        # to_k2 / to_v2 exist in the PyTorch __init__ but are never used in forward:
        "wk2":  s * jax.random.normal(ks[7], (D, D), jnp.float32),
        "wv2":  s * jax.random.normal(ks[8], (D, D), jnp.float32),
        "wout": s * jax.random.normal(ks[9], (2 * D, D), jnp.float32),
        "bout": s * jax.random.normal(ks[10], (1, D), jnp.float32),
    }

    ref = reference(c1, c2, c3, params, heads=heads)

    # default batch blocking (whole batch in one grid step here)
    out = jax.block_until_ready(attention_global3(c1, c2, c3, params, heads=heads))
    assert out.shape == (B, N, D)
    assert jnp.allclose(out, ref, atol=1e-4, rtol=1e-4), \
        f"max abs err = {jnp.max(jnp.abs(out - ref))}"

    # also exercise a multi-step grid (batch_block=1) to validate the index maps
    out2 = jax.block_until_ready(
        attention_global3(c1, c2, c3, params, heads=heads, batch_block=1))
    assert jnp.allclose(out2, ref, atol=1e-4, rtol=1e-4), \
        f"max abs err (bb=1) = {jnp.max(jnp.abs(out2 - ref))}"

    print("KERNEL_OK")
</pallas_src>

<mosaic_0001>
module attributes {stable_mosaic.version = 11 : i64} {
  func.func @_attn_kernel(%arg0: i32, %arg1: memref<2x8x32xf32, #tpu.memory_space<vmem>>, %arg2: memref<2x8x32xf32, #tpu.memory_space<vmem>>, %arg3: memref<2x8x32xf32, #tpu.memory_space<vmem>>, %arg4: memref<32x64xf32, #tpu.memory_space<vmem>>, %arg5: memref<32x64xf32, #tpu.memory_space<vmem>>, %arg6: memref<4x16x32xf32, #tpu.memory_space<vmem>>, %arg7: memref<1x32xf32, #tpu.memory_space<vmem>>, %arg8: memref<2x8x32xf32, #tpu.memory_space<vmem>>) attributes {dimension_semantics = [#tpu.dimension_semantics<parallel>], iteration_bounds = array<i64: 1>, scalar_prefetch = 0 : i64, scratch_operands = 0 : i64, tpu.core_type = #tpu.core_type<tc>, window_params = [{transform_indices = @transform_0, window_bounds = array<i64: 2, 8, 32>}, {transform_indices = @transform_1, window_bounds = array<i64: 2, 8, 32>}, {transform_indices = @transform_2, window_bounds = array<i64: 2, 8, 32>}, {pipeline_mode = #tpu.pipeline_mode<synchronous>, transform_indices = @transform_3, window_bounds = array<i64: 32, 64>}, {pipeline_mode = #tpu.pipeline_mode<synchronous>, transform_indices = @transform_4, window_bounds = array<i64: 32, 64>}, {pipeline_mode = #tpu.pipeline_mode<synchronous>, transform_indices = @transform_5, window_bounds = array<i64: 4, 16, 32>}, {pipeline_mode = #tpu.pipeline_mode<synchronous>, transform_indices = @transform_6, window_bounds = array<i64: 1, 32>}, {transform_indices = @transform_7, window_bounds = array<i64: 2, 8, 32>}]} {
    %c0 = arith.constant 0 : index
    %c0_0 = arith.constant 0 : index
    %c0_1 = arith.constant 0 : index
    %0 = vector.load %arg3[%c0, %c0_0, %c0_1] : memref<2x8x32xf32, #tpu.memory_space<vmem>>, vector<2x8x32xf32>
    %1 = vector.shape_cast %0 : vector<2x8x32xf32> to vector<16x32xf32>
    %c0_2 = arith.constant 0 : index
    %c0_3 = arith.constant 0 : index
    %2 = vector.load %arg4[%c0_2, %c0_3] : memref<32x64xf32, #tpu.memory_space<vmem>>, vector<32x64xf32>
    %cst = arith.constant dense<0.000000e+00> : vector<16x64xf32>
    %3 = tpu.matmul %1, %2, %cst {dimension_numbers = #tpu.dot_dimension_numbers<[1], [0], [0], [1], [0, 0, 1, 1], [], []>} : vector<16x32xf32>, vector<32x64xf32>, vector<16x64xf32> -> vector<16x64xf32>
    %cst_4 = arith.constant 0.000000e+00 : f32
    %4 = vector.broadcast %cst_4 : f32 to vector<16x32xf32>
    %c0_5 = arith.constant 0 : index
    %c0_6 = arith.constant 0 : index
    %c0_7 = arith.constant 0 : index
    %5 = vector.load %arg2[%c0_5, %c0_6, %c0_7] : memref<2x8x32xf32, #tpu.memory_space<vmem>>, vector<2x8x32xf32>
    %6 = vector.shape_cast %5 : vector<2x8x32xf32> to vector<16x32xf32>
    %c0_8 = arith.constant 0 : index
    %c0_9 = arith.constant 0 : index
    %7 = vector.load %arg5[%c0_8, %c0_9] : memref<32x64xf32, #tpu.memory_space<vmem>>, vector<32x64xf32>
    %cst_10 = arith.constant dense<0.000000e+00> : vector<16x64xf32>
    %8 = tpu.matmul %6, %7, %cst_10 {dimension_numbers = #tpu.dot_dimension_numbers<[1], [0], [0], [1], [0, 0, 1, 1], [], []>} : vector<16x32xf32>, vector<32x64xf32>, vector<16x64xf32> -> vector<16x64xf32>
    %9 = vector.extract_strided_slice %3 {offsets = [0, 0], sizes = [16, 16], strides = [1, 1]} : vector<16x64xf32> to vector<16x16xf32>
    %10 = vector.shape_cast %9 : vector<16x16xf32> to vector<2x8x16xf32>
    %11 = vector.extract_strided_slice %8 {offsets = [0, 0], sizes = [16, 16], strides = [1, 1]} : vector<16x64xf32> to vector<16x16xf32>
    %12 = vector.shape_cast %11 : vector<16x16xf32> to vector<2x8x16xf32>
    %13 = vector.extract_strided_slice %8 {offsets = [0, 32], sizes = [16, 16], strides = [1, 1]} : vector<16x64xf32> to vector<16x16xf32>
    %14 = vector.shape_cast %13 : vector<16x16xf32> to vector<2x8x16xf32>
    "tpu.trace_start"() <{level = 10 : i32, message = "bnd,bmd->bnm"}> : () -> ()
    %cst_11 = arith.constant dense<0.000000e+00> : vector<2x8x8xf32>
    %15 = tpu.matmul %10, %12, %cst_11 {dimension_numbers = #tpu.dot_dimension_numbers<[2], [2], [1], [1], [0, 0, 0, 1, 1, 1], [0], [0]>} : vector<2x8x16xf32>, vector<2x8x16xf32>, vector<2x8x8xf32> -> vector<2x8x8xf32>
    "tpu.trace_stop"() : () -> ()
    %cst_12 = arith.constant dense<0xFF800000> : vector<2x8xf32>
    %16 = vector.multi_reduction <maximumf>, %15, %cst_12 [2] : vector<2x8x8xf32> to vector<2x8xf32>
    %17 = vector.shape_cast %16 : vector<2x8xf32> to vector<2x8x1xf32>
    %18 = vector.broadcast %17 : vector<2x8x1xf32> to vector<2x8x8xf32>
    %19 = arith.subf %15, %18 : vector<2x8x8xf32>
    %20 = math.exp %19 : vector<2x8x8xf32>
    %cst_13 = arith.constant dense<0.000000e+00> : vector<2x8xf32>
    %21 = vector.multi_reduction <add>, %20, %cst_13 [2] : vector<2x8x8xf32> to vector<2x8xf32>
    %22 = vector.shape_cast %21 : vector<2x8xf32> to vector<2x8x1xf32>
    %23 = tpu.reciprocal %22 {approx = true} : vector<2x8x1xf32> -> vector<2x8x1xf32>
    %24 = arith.mulf %22, %23 : vector<2x8x1xf32>
    %cst_14 = arith.constant 2.000000e+00 : f32
    %25 = vector.broadcast %cst_14 : f32 to vector<2x8x1xf32>
    %26 = arith.subf %25, %24 : vector<2x8x1xf32>
    %27 = arith.mulf %23, %26 : vector<2x8x1xf32>
    %28 = vector.broadcast %27 : vector<2x8x1xf32> to vector<2x8x8xf32>
    %29 = arith.mulf %20, %28 : vector<2x8x8xf32>
    "tpu.trace_start"() <{level = 10 : i32, message = "bnm,bmd->bnd"}> : () -> ()
    %cst_15 = arith.constant dense<0.000000e+00> : vector<2x8x16xf32>
    %30 = tpu.matmul %29, %14, %cst_15 {dimension_numbers = #tpu.dot_dimension_numbers<[2], [1], [1], [2], [0, 0, 0, 1, 1, 2], [0], [0]>} : vector<2x8x8xf32>, vector<2x8x16xf32>, vector<2x8x16xf32> -> vector<2x8x16xf32>
    "tpu.trace_stop"() : () -> ()
    %c0_16 = arith.constant 0 : index
    %c0_17 = arith.constant 0 : index
    %c0_18 = arith.constant 0 : index
    %31 = vector.load %arg6[%c0_16, %c0_17, %c0_18] : memref<4x16x32xf32, #tpu.memory_space<vmem>>, vector<1x16x32xf32>
    %32 = vector.shape_cast %31 : vector<1x16x32xf32> to vector<16x32xf32>
    %33 = vector.shape_cast %30 : vector<2x8x16xf32> to vector<16x16xf32>
    %cst_19 = arith.constant dense<0.000000e+00> : vector<16x32xf32>
    %34 = tpu.matmul %33, %32, %cst_19 {dimension_numbers = #tpu.dot_dimension_numbers<[1], [0], [0], [1], [0, 0, 1, 1], [], []>} : vector<16x16xf32>, vector<16x32xf32>, vector<16x32xf32> -> vector<16x32xf32>
    %35 = arith.addf %4, %34 : vector<16x32xf32>
    %36 = vector.extract_strided_slice %3 {offsets = [0, 16], sizes = [16, 16], strides = [1, 1]} : vector<16x64xf32> to vector<16x16xf32>
    %37 = vector.shape_cast %36 : vector<16x16xf32> to vector<2x8x16xf32>
    %38 = vector.extract_strided_slice %8 {offsets = [0, 16], sizes = [16, 16], strides = [1, 1]} : vector<16x64xf32> to vector<16x16xf32>
    %39 = vector.shape_cast %38 : vector<16x16xf32> to vector<2x8x16xf32>
    %40 = vector.extract_strided_slice %8 {offsets = [0, 48], sizes = [16, 16], strides = [1, 1]} : vector<16x64xf32> to vector<16x16xf32>
    %41 = vector.shape_cast %40 : vector<16x16xf32> to vector<2x8x16xf32>
    "tpu.trace_start"() <{level = 10 : i32, message = "bnd,bmd->bnm"}> : () -> ()
    %cst_20 = arith.constant dense<0.000000e+00> : vector<2x8x8xf32>
    %42 = tpu.matmul %37, %39, %cst_20 {dimension_numbers = #tpu.dot_dimension_numbers<[2], [2], [1], [1], [0, 0, 0, 1, 1, 1], [0], [0]>} : vector<2x8x16xf32>, vector<2x8x16xf32>, vector<2x8x8xf32> -> vector<2x8x8xf32>
    "tpu.trace_stop"() : () -> ()
    %cst_21 = arith.constant dense<0xFF800000> : vector<2x8xf32>
    %43 = vector.multi_reduction <maximumf>, %42, %cst_21 [2] : vector<2x8x8xf32> to vector<2x8xf32>
    %44 = vector.shape_cast %43 : vector<2x8xf32> to vector<2x8x1xf32>
    %45 = vector.broadcast %44 : vector<2x8x1xf32> to vector<2x8x8xf32>
    %46 = arith.subf %42, %45 : vector<2x8x8xf32>
    %47 = math.exp %46 : vector<2x8x8xf32>
    %cst_22 = arith.constant dense<0.000000e+00> : vector<2x8xf32>
    %48 = vector.multi_reduction <add>, %47, %cst_22 [2] : vector<2x8x8xf32> to vector<2x8xf32>
    %49 = vector.shape_cast %48 : vector<2x8xf32> to vector<2x8x1xf32>
    %50 = tpu.reciprocal %49 {approx = true} : vector<2x8x1xf32> -> vector<2x8x1xf32>
    %51 = arith.mulf %49, %50 : vector<2x8x1xf32>
    %cst_23 = arith.constant 2.000000e+00 : f32
    %52 = vector.broadcast %cst_23 : f32 to vector<2x8x1xf32>
    %53 = arith.subf %52, %51 : vector<2x8x1xf32>
    %54 = arith.mulf %50, %53 : vector<2x8x1xf32>
    %55 = vector.broadcast %54 : vector<2x8x1xf32> to vector<2x8x8xf32>
    %56 = arith.mulf %47, %55 : vector<2x8x8xf32>
    "tpu.trace_start"() <{level = 10 : i32, message = "bnm,bmd->bnd"}> : () -> ()
    %cst_24 = arith.constant dense<0.000000e+00> : vector<2x8x16xf32>
    %57 = tpu.matmul %56, %41, %cst_24 {dimension_numbers = #tpu.dot_dimension_numbers<[2], [1], [1], [2], [0, 0, 0, 1, 1, 2], [0], [0]>} : vector<2x8x8xf32>, vector<2x8x16xf32>, vector<2x8x16xf32> -> vector<2x8x16xf32>
    "tpu.trace_stop"() : () -> ()
    %c1 = arith.constant 1 : index
    %c0_25 = arith.constant 0 : index
    %c0_26 = arith.constant 0 : index
    %58 = vector.load %arg6[%c1, %c0_25, %c0_26] : memref<4x16x32xf32, #tpu.memory_space<vmem>>, vector<1x16x32xf32>
    %59 = vector.shape_cast %58 : vector<1x16x32xf32> to vector<16x32xf32>
    %60 = vector.shape_cast %57 : vector<2x8x16xf32> to vector<16x16xf32>
    %cst_27 = arith.constant dense<0.000000e+00> : vector<16x32xf32>
    %61 = tpu.matmul %60, %59, %cst_27 {dimension_numbers = #tpu.dot_dimension_numbers<[1], [0], [0], [1], [0, 0, 1, 1], [], []>} : vector<16x16xf32>, vector<16x32xf32>, vector<16x32xf32> -> vector<16x32xf32>
    %62 = arith.addf %35, %61 : vector<16x32xf32>
    %c0_28 = arith.constant 0 : index
    %c0_29 = arith.constant 0 : index
    %c0_30 = arith.constant 0 : index
    %63 = vector.load %arg1[%c0_28, %c0_29, %c0_30] : memref<2x8x32xf32, #tpu.memory_space<vmem>>, vector<2x8x32xf32>
    %64 = vector.shape_cast %63 : vector<2x8x32xf32> to vector<16x32xf32>
    %c0_31 = arith.constant 0 : index
    %c0_32 = arith.constant 0 : index
    %65 = vector.load %arg5[%c0_31, %c0_32] : memref<32x64xf32, #tpu.memory_space<vmem>>, vector<32x64xf32>
    %cst_33 = arith.constant dense<0.000000e+00> : vector<16x64xf32>
    %66 = tpu.matmul %64, %65, %cst_33 {dimension_numbers = #tpu.dot_dimension_numbers<[1], [0], [0], [1], [0, 0, 1, 1], [], []>} : vector<16x32xf32>, vector<32x64xf32>, vector<16x64xf32> -> vector<16x64xf32>
    %67 = vector.extract_strided_slice %3 {offsets = [0, 32], sizes = [16, 16], strides = [1, 1]} : vector<16x64xf32> to vector<16x16xf32>
    %68 = vector.shape_cast %67 : vector<16x16xf32> to vector<2x8x16xf32>
    %69 = vector.extract_strided_slice %66 {offsets = [0, 0], sizes = [16, 16], strides = [1, 1]} : vector<16x64xf32> to vector<16x16xf32>
    %70 = vector.shape_cast %69 : vector<16x16xf32> to vector<2x8x16xf32>
    %71 = vector.extract_strided_slice %66 {offsets = [0, 32], sizes = [16, 16], strides = [1, 1]} : vector<16x64xf32> to vector<16x16xf32>
    %72 = vector.shape_cast %71 : vector<16x16xf32> to vector<2x8x16xf32>
    "tpu.trace_start"() <{level = 10 : i32, message = "bnd,bmd->bnm"}> : () -> ()
    %cst_34 = arith.constant dense<0.000000e+00> : vector<2x8x8xf32>
    %73 = tpu.matmul %68, %70, %cst_34 {dimension_numbers = #tpu.dot_dimension_numbers<[2], [2], [1], [1], [0, 0, 0, 1, 1, 1], [0], [0]>} : vector<2x8x16xf32>, vector<2x8x16xf32>, vector<2x8x8xf32> -> vector<2x8x8xf32>
    "tpu.trace_stop"() : () -> ()
    %cst_35 = arith.constant dense<0xFF800000> : vector<2x8xf32>
    %74 = vector.multi_reduction <maximumf>, %73, %cst_35 [2] : vector<2x8x8xf32> to vector<2x8xf32>
    %75 = vector.shape_cast %74 : vector<2x8xf32> to vector<2x8x1xf32>
    %76 = vector.broadcast %75 : vector<2x8x1xf32> to vector<2x8x8xf32>
    %77 = arith.subf %73, %76 : vector<2x8x8xf32>
    %78 = math.exp %77 : vector<2x8x8xf32>
    %cst_36 = arith.constant dense<0.000000e+00> : vector<2x8xf32>
    %79 = vector.multi_reduction <add>, %78, %cst_36 [2] : vector<2x8x8xf32> to vector<2x8xf32>
    %80 = vector.shape_cast %79 : vector<2x8xf32> to vector<2x8x1xf32>
    %81 = tpu.reciprocal %80 {approx = true} : vector<2x8x1xf32> -> vector<2x8x1xf32>
    %82 = arith.mulf %80, %81 : vector<2x8x1xf32>
    %cst_37 = arith.constant 2.000000e+00 : f32
    %83 = vector.broadcast %cst_37 : f32 to vector<2x8x1xf32>
    %84 = arith.subf %83, %82 : vector<2x8x1xf32>
    %85 = arith.mulf %81, %84 : vector<2x8x1xf32>
    %86 = vector.broadcast %85 : vector<2x8x1xf32> to vector<2x8x8xf32>
    %87 = arith.mulf %78, %86 : vector<2x8x8xf32>
    "tpu.trace_start"() <{level = 10 : i32, message = "bnm,bmd->bnd"}> : () -> ()
    %cst_38 = arith.constant dense<0.000000e+00> : vector<2x8x16xf32>
    %88 = tpu.matmul %87, %72, %cst_38 {dimension_numbers = #tpu.dot_dimension_numbers<[2], [1], [1], [2], [0, 0, 0, 1, 1, 2], [0], [0]>} : vector<2x8x8xf32>, vector<2x8x16xf32>, vector<2x8x16xf32> -> vector<2x8x16xf32>
    "tpu.trace_stop"() : () -> ()
    %c2 = arith.constant 2 : index
    %c0_39 = arith.constant 0 : index
    %c0_40 = arith.constant 0 : index
    %89 = vector.load %arg6[%c2, %c0_39, %c0_40] : memref<4x16x32xf32, #tpu.memory_space<vmem>>, vector<1x16x32xf32>
    %90 = vector.shape_cast %89 : vector<1x16x32xf32> to vector<16x32xf32>
    %91 = vector.shape_cast %88 : vector<2x8x16xf32> to vector<16x16xf32>
    %cst_41 = arith.constant dense<0.000000e+00> : vector<16x32xf32>
    %92 = tpu.matmul %91, %90, %cst_41 {dimension_numbers = #tpu.dot_dimension_numbers<[1], [0], [0], [1], [0, 0, 1, 1], [], []>} : vector<16x16xf32>, vector<16x32xf32>, vector<16x32xf32> -> vector<16x32xf32>
    %93 = arith.addf %62, %92 : vector<16x32xf32>
    %94 = vector.extract_strided_slice %3 {offsets = [0, 48], sizes = [16, 16], strides = [1, 1]} : vector<16x64xf32> to vector<16x16xf32>
    %95 = vector.shape_cast %94 : vector<16x16xf32> to vector<2x8x16xf32>
    %96 = vector.extract_strided_slice %66 {offsets = [0, 16], sizes = [16, 16], strides = [1, 1]} : vector<16x64xf32> to vector<16x16xf32>
    %97 = vector.shape_cast %96 : vector<16x16xf32> to vector<2x8x16xf32>
    %98 = vector.extract_strided_slice %66 {offsets = [0, 48], sizes = [16, 16], strides = [1, 1]} : vector<16x64xf32> to vector<16x16xf32>
    %99 = vector.shape_cast %98 : vector<16x16xf32> to vector<2x8x16xf32>
    "tpu.trace_start"() <{level = 10 : i32, message = "bnd,bmd->bnm"}> : () -> ()
    %cst_42 = arith.constant dense<0.000000e+00> : vector<2x8x8xf32>
    %100 = tpu.matmul %95, %97, %cst_42 {dimension_numbers = #tpu.dot_dimension_numbers<[2], [2], [1], [1], [0, 0, 0, 1, 1, 1], [0], [0]>} : vector<2x8x16xf32>, vector<2x8x16xf32>, vector<2x8x8xf32> -> vector<2x8x8xf32>
    "tpu.trace_stop"() : () -> ()
    %cst_43 = arith.constant dense<0xFF800000> : vector<2x8xf32>
    %101 = vector.multi_reduction <maximumf>, %100, %cst_43 [2] : vector<2x8x8xf32> to vector<2x8xf32>
    %102 = vector.shape_cast %101 : vector<2x8xf32> to vector<2x8x1xf32>
    %103 = vector.broadcast %102 : vector<2x8x1xf32> to vector<2x8x8xf32>
    %104 = arith.subf %100, %103 : vector<2x8x8xf32>
    %105 = math.exp %104 : vector<2x8x8xf32>
    %cst_44 = arith.constant dense<0.000000e+00> : vector<2x8xf32>
    %106 = vector.multi_reduction <add>, %105, %cst_44 [2] : vector<2x8x8xf32> to vector<2x8xf32>
    %107 = vector.shape_cast %106 : vector<2x8xf32> to vector<2x8x1xf32>
    %108 = tpu.reciprocal %107 {approx = true} : vector<2x8x1xf32> -> vector<2x8x1xf32>
    %109 = arith.mulf %107, %108 : vector<2x8x1xf32>
    %cst_45 = arith.constant 2.000000e+00 : f32
    %110 = vector.broadcast %cst_45 : f32 to vector<2x8x1xf32>
    %111 = arith.subf %110, %109 : vector<2x8x1xf32>
    %112 = arith.mulf %108, %111 : vector<2x8x1xf32>
    %113 = vector.broadcast %112 : vector<2x8x1xf32> to vector<2x8x8xf32>
    %114 = arith.mulf %105, %113 : vector<2x8x8xf32>
    "tpu.trace_start"() <{level = 10 : i32, message = "bnm,bmd->bnd"}> : () -> ()
    %cst_46 = arith.constant dense<0.000000e+00> : vector<2x8x16xf32>
    %115 = tpu.matmul %114, %99, %cst_46 {dimension_numbers = #tpu.dot_dimension_numbers<[2], [1], [1], [2], [0, 0, 0, 1, 1, 2], [0], [0]>} : vector<2x8x8xf32>, vector<2x8x16xf32>, vector<2x8x16xf32> -> vector<2x8x16xf32>
    "tpu.trace_stop"() : () -> ()
    %c3 = arith.constant 3 : index
    %c0_47 = arith.constant 0 : index
    %c0_48 = arith.constant 0 : index
    %116 = vector.load %arg6[%c3, %c0_47, %c0_48] : memref<4x16x32xf32, #tpu.memory_space<vmem>>, vector<1x16x32xf32>
    %117 = vector.shape_cast %116 : vector<1x16x32xf32> to vector<16x32xf32>
    %118 = vector.shape_cast %115 : vector<2x8x16xf32> to vector<16x16xf32>
    %cst_49 = arith.constant dense<0.000000e+00> : vector<16x32xf32>
    %119 = tpu.matmul %118, %117, %cst_49 {dimension_numbers = #tpu.dot_dimension_numbers<[1], [0], [0], [1], [0, 0, 1, 1], [], []>} : vector<16x16xf32>, vector<16x32xf32>, vector<16x32xf32> -> vector<16x32xf32>
    %120 = arith.addf %93, %119 : vector<16x32xf32>
    %c0_50 = arith.constant 0 : index
    %c0_51 = arith.constant 0 : index
    %121 = vector.load %arg7[%c0_50, %c0_51] : memref<1x32xf32, #tpu.memory_space<vmem>>, vector<1x32xf32>
    %122 = vector.broadcast %121 : vector<1x32xf32> to vector<16x32xf32>
    %123 = arith.addf %120, %122 : vector<16x32xf32>
    %124 = vector.shape_cast %123 : vector<16x32xf32> to vector<2x8x32xf32>
    %c0_52 = arith.constant 0 : index
    %c0_53 = arith.constant 0 : index
    %c0_54 = arith.constant 0 : index
    %125 = vector.load %arg8[%c0_52, %c0_53, %c0_54] : memref<2x8x32xf32, #tpu.memory_space<vmem>>, vector<2x8x32xf32>
    tpu.vector_store %arg8[%c0_52, %c0_53, %c0_54], %124 {strides = array<i32>} : memref<2x8x32xf32, #tpu.memory_space<vmem>>, vector<2x8x32xf32>,
    return
  }
  func.func @transform_0(%arg0: i32) -> (i32, i32, i32) {
    %c0_i32 = arith.constant 0 : i32
    %c0_i32_0 = arith.constant 0 : i32
    %c0_i32_1 = arith.constant 0 : i32
    return %arg0, %c0_i32, %c0_i32_0 : i32, i32, i32
  }
  func.func @transform_1(%arg0: i32) -> (i32, i32, i32) {
    %c0_i32 = arith.constant 0 : i32
    %c0_i32_0 = arith.constant 0 : i32
    %c0_i32_1 = arith.constant 0 : i32
    return %arg0, %c0_i32, %c0_i32_0 : i32, i32, i32
  }
  func.func @transform_2(%arg0: i32) -> (i32, i32, i32) {
    %c0_i32 = arith.constant 0 : i32
    %c0_i32_0 = arith.constant 0 : i32
    %c0_i32_1 = arith.constant 0 : i32
    return %arg0, %c0_i32, %c0_i32_0 : i32, i32, i32
  }
  func.func @transform_3(%arg0: i32) -> (i32, i32) {
    %c0_i32 = arith.constant 0 : i32
    %c0_i32_0 = arith.constant 0 : i32
    %c0_i32_1 = arith.constant 0 : i32
    return %c0_i32, %c0_i32_0 : i32, i32
  }
  func.func @transform_4(%arg0: i32) -> (i32, i32) {
    %c0_i32 = arith.constant 0 : i32
    %c0_i32_0 = arith.constant 0 : i32
    %c0_i32_1 = arith.constant 0 : i32
    return %c0_i32, %c0_i32_0 : i32, i32
  }
  func.func @transform_5(%arg0: i32) -> (i32, i32, i32) {
    %c0_i32 = arith.constant 0 : i32
    %c0_i32_0 = arith.constant 0 : i32
    %c0_i32_1 = arith.constant 0 : i32
    %c0_i32_2 = arith.constant 0 : i32
    return %c0_i32, %c0_i32_0, %c0_i32_1 : i32, i32, i32
  }
  func.func @transform_6(%arg0: i32) -> (i32, i32) {
    %c0_i32 = arith.constant 0 : i32
    %c0_i32_0 = arith.constant 0 : i32
    %c0_i32_1 = arith.constant 0 : i32
    return %c0_i32, %c0_i32_0 : i32, i32
  }
  func.func @transform_7(%arg0: i32) -> (i32, i32, i32) {
    %c0_i32 = arith.constant 0 : i32
    %c0_i32_0 = arith.constant 0 : i32
    %c0_i32_1 = arith.constant 0 : i32
    return %arg0, %c0_i32, %c0_i32_0 : i32, i32, i32
  }
}

</mosaic_0001>

<bundles_post_ra>
// kernel: tpu_custom_call.1
= control target key start
LH: loop header
LB: loop body
LE: loop exit
PB: predicated region body
PF: predicated region fallthrough
CT: control target
= control target key end

     0   :  { %12 = vsyncpa [#allocation3], 0  ;;  %s2816_s0 = inlined_call_operand.hbm [shape: f32[2,8,32], index: 0, kind: input, shape index: {}]   ;;  %s2817_s1 = inlined_call_operand.hbm [shape: f32[2,8,32], index: 1, kind: input, shape index: {}]   ;;  %s2818_s2 = inlined_call_operand.hbm [shape: f32[2,8,32], index: 2, kind: input, shape index: {}]   ;;  %s2819_s3 = inlined_call_operand.hbm [shape: f32[32,64], index: 3, kind: input, shape index: {}]   ;;  %s2820_s4 = inlined_call_operand.hbm [shape: f32[32,64], index: 4, kind: input, shape index: {}]   ;;  %s2821_s5 = inlined_call_operand.hbm [shape: f32[4,16,32], index: 5, kind: input, shape index: {}]   ;;  %s2822_s6 = inlined_call_operand.vmem [shape: f32[1,32], index: 6, kind: input, shape index: {}]   ;;  %s2823_s7 = inlined_call_operand.hbm [shape: f32[2,8,32], index: 7, kind: output, shape index: {}]  }
   0x1   :  { %13 = vsyncpa [#allocation6], 0 }
   0x2   :  { %14 = vsyncpa [#allocation9], 0 }
   0x3   :  { %15 = vsyncpa [#allocation12], 0 }
   0x4   :  { %16 = vsyncpa [#allocation4], 0  ;;  %s2523_s24 = smov [#allocation5]   ;;  %s2524_s26 = smov [#allocation8]  }
   0x5   :  { %s34_s25 = sshll.u32 %s2523_s24, 4  ;;  %s58_s27 = sshll.u32 %s2524_s26, 4  ;;  %s35_s25 = int_to_ptr.vmem [resolvable:$true] %s34_s25  ;;  %s59_s27 = int_to_ptr.vmem [resolvable:$true] %s58_s27 }
   0x6   :  { %s2381_s28 = scalar_lea.vmem %s35_s25, 256  ;;  %p2386_p1 = scmp.lt.s32.totalorder %s35_s25, %s35_s25 }
   0x7   :  { %p2382_p0 = scmp.ne.s32.totalorder %s35_s25, %s2381_s28  ;;  %p2387_p2 = scmp.lt.s32.totalorder %s2381_s28, %s2381_s28 }
   0x9   :  { %p2388_p3 = por %p2387_p2, %p2386_p1 }
   0xb   :  { %p2389_p4 = pnand %p2388_p3, %p2382_p0 }
   0xd   :  { %2392 = shalt.err (!%p2389_p4)
}
   0xe   :  { %s2525_s29 = smov 128   ;;  %s2526_s30 = smov 8  }
   0xf   :  { %40 = dma.hbm_to_vmem [thread:$0]  %s2817_s1, 256, %s35_s25, [#allocation6], %s2525_s29, %s2525_s29, %s2526_s30  }
  0x10   :  { %s2401_s10 = scalar_lea.vmem %s59_s27, 512  ;;  %p2406_p6 = scmp.lt.s32.totalorder %s59_s27, %s59_s27 }
  0x11   :  { %p2402_p5 = scmp.ne.s32.totalorder %s59_s27, %s2401_s10  ;;  %p2407_p7 = scmp.lt.s32.totalorder %s2401_s10, %s2401_s10 }
  0x13   :  { %p2408_p8 = por %p2407_p7, %p2406_p6 }
  0x15   :  { %p2409_p9 = pnand %p2408_p8, %p2402_p5 }
  0x17   :  { %2412 = shalt.err (!%p2409_p9)
}
  0x18   :  { %64 = dma.hbm_to_vmem [thread:$0]  %s2819_s3, 512, %s59_s27, [#allocation9], %s2525_s29, %s2525_s29, %s2526_s30  }
  0x19   :  { %s2527_s13 = smov [#allocation2]   ;;  %s2528_s15 = smov [#allocation7]  }
  0x1a   :  { %s22_s14 = sshll.u32 %s2527_s13, 4  ;;  %s46_s16 = sshll.u32 %s2528_s15, 4  ;;  %s23_s14 = int_to_ptr.vmem [resolvable:$true] %s22_s14  ;;  %s47_s16 = int_to_ptr.vmem [resolvable:$true] %s46_s16 }
  0x1b   :  { %s2421_s1 = scalar_lea.vmem %s23_s14, 256  ;;  %p2426_p11 = scmp.lt.s32.totalorder %s23_s14, %s23_s14 }
  0x1c   :  { %p2422_p10 = scmp.ne.s32.totalorder %s23_s14, %s2421_s1  ;;  %p2427_p12 = scmp.lt.s32.totalorder %s2421_s1, %s2421_s1 }
  0x1e   :  { %p2428_p13 = por %p2427_p12, %p2426_p11 }
  0x20   :  { %p2429_p0 = pnand %p2428_p13, %p2422_p10 }
  0x22   :  { %2432 = shalt.err (!%p2429_p0)
}
  0x23   :  { %28 = dma.hbm_to_vmem [thread:$0]  %s2816_s0, 256, %s23_s14, [#allocation3], %s2525_s29, %s2525_s29, %s2526_s30  }
  0x24   :  { %s2441_s3 = scalar_lea.vmem %s47_s16, 256  ;;  %p2446_p2 = scmp.lt.s32.totalorder %s47_s16, %s47_s16 }
  0x25   :  { %p2442_p1 = scmp.ne.s32.totalorder %s47_s16, %s2441_s3  ;;  %p2447_p3 = scmp.lt.s32.totalorder %s2441_s3, %s2441_s3 }
  0x27   :  { %p2448_p4 = por %p2447_p3, %p2446_p2 }
  0x29   :  { %p2449_p5 = pnand %p2448_p4, %p2442_p1 }
  0x2b   :  { %2452 = shalt.err (!%p2449_p5)
}
  0x2c   :  { %52 = dma.hbm_to_vmem [thread:$0]  %s2818_s2, 256, %s47_s16, [#allocation6], %s2525_s29, %s2525_s29, %s2526_s30  }
  0x2d   :  { %s2529_s21 = smov [#allocation10]   ;;  %s2530_s23 = smov [#allocation11]  }
  0x2e   :  { %s70_s22 = sshll.u32 %s2529_s21, 4  ;;  %s82_s24 = sshll.u32 %s2530_s23, 4  ;;  %s71_s22 = int_to_ptr.vmem [resolvable:$true] %s70_s22  ;;  %s83_s24 = int_to_ptr.vmem [resolvable:$true] %s82_s24 }
  0x2f   :  { %s2461_s0 = scalar_lea.vmem %s71_s22, 512  ;;  %p2466_p7 = scmp.lt.s32.totalorder %s71_s22, %s71_s22 }
  0x30   :  { %p2462_p6 = scmp.ne.s32.totalorder %s71_s22, %s2461_s0  ;;  %p2467_p8 = scmp.lt.s32.totalorder %s2461_s0, %s2461_s0 }
  0x32   :  { %p2468_p9 = por %p2467_p8, %p2466_p7 }
  0x34   :  { %p2469_p10 = pnand %p2468_p9, %p2462_p6 }
  0x36   :  { %2472 = shalt.err (!%p2469_p10)
}
  0x37   :  { %76 = dma.hbm_to_vmem [thread:$0]  %s2820_s4, 512, %s71_s22, [#allocation9], %s2525_s29, %s2525_s29, %s2526_s30  }
  0x38   :  { %s2481_s2 = scalar_lea.vmem %s83_s24, 1024  ;;  %p2486_p12 = scmp.lt.s32.totalorder %s83_s24, %s83_s24 }
  0x39   :  { %p2482_p11 = scmp.ne.s32.totalorder %s83_s24, %s2481_s2  ;;  %p2487_p13 = scmp.lt.s32.totalorder %s2481_s2, %s2481_s2 }
  0x3b   :  { %p2488_p0 = por %p2487_p13, %p2486_p12 }
  0x3d   :  { %p2489_p1 = pnand %p2488_p0, %p2482_p11 }
  0x3f   :  { %2492 = shalt.err (!%p2489_p1)
}
  0x40   :  { %88 = dma.hbm_to_vmem [thread:$0]  %s2821_s5, 1024, %s83_s24, [#allocation12], %s2525_s29, %s2525_s29, %s2526_s30  }
  0x41   :  { %2513 = dma.done.wait [#allocation3], 256  }
  0x42   :  { %2514 = vsyncadd [#allocation3], 4294967040 }
  0x43   :  { %2515 = dma.done.wait [#allocation6], 512  }
  0x44   :  { %2516 = vsyncadd [#allocation6], 4294966784 }
  0x45   :  { %2517 = dma.done.wait [#allocation9], 1024  }
  0x46   :  { %2518 = vsyncadd [#allocation9], 4294966272 }
  0x47   :  { %2519 = dma.done.wait [#allocation12], 1024  }
  0x48   :  { %2520 = vsyncadd [#allocation12], 4294966272  ;;  %v2613_v0 = vld [vmem:[#allocation10 + $0x18] sm:$0xff]  ;;  %v2615_v2 = vld [vmem:[#allocation10 + $0x10] sm:$0xff]  ;;  %vm115_vm0 = vcmask 261120   ;;  %v2531_v12 = vmov 0.0  }
  0x49   :  { %v114_v1 = vld [vmem:[#allocation8 + $0x18] sm:$0xff]  ;;  %2197 = vmatprep.subr.mxu1 %v2613_v0  ;;  %v113_v3 = vld [vmem:[#allocation8 + $0x10] sm:$0xff]  ;;  %v2619_v4 = vld [vmem:[#allocation10 + $0x8] sm:$0xff]  ;;  %vm2532_vm1 = vmmov 0   ;;  %vm284_vm2 = vcmask 130048   ;;  %s2533_s4 = smov 96  }
  0x4a   :  { %2186 = vmatprep.subr.mxu0 %v114_v1  ;;  %2198 = vmatpush3.msra.mxu1 %v2613_v0  ;;  %v112_v5 = vld [vmem:[#allocation8 + $0x8] sm:$0xff]  ;;  %v2623_v6 = vld [vmem:[#allocation10] sm:$0xff]  ;;  %v109_v9 = vld [vmem:[#allocation7] sm:$0xff]  ;;  %s2534_s5 = smov 112   ;;  %vm437_vm3 = vcmask 64512   ;;  %s2535_s8 = smov 80  }
  0x4b   :  { %2187 = vmatpush3.msra.mxu0 %v114_v1  ;;  %2199 = vmatprep.subr.mxu1 %v2615_v2  ;;  %v111_v7 = vld [vmem:[#allocation8] sm:$0xff]  ;;  %v198_v10 = vld [vmem:[#allocation5 + $0x8] sm:$0xff]  ;;  %v110_v11 = vld [vmem:[#allocation7 + $0x8] sm:$0xff]  ;;  %s2536_s11 = smov [#allocation13]  }
  0x4c   :  { %2188 = vmatprep.subr.mxu0 %v113_v3  ;;  %2200 = vmatpush3.msra.mxu1 %v2615_v2  ;;  %v197_v8 = vld [vmem:[#allocation5] sm:$0xff]  ;;  %s2066_s12 = sshll.u32 %s2536_s11, 4  ;;  %s2067_s12 = int_to_ptr.vmem [resolvable:$true] %s2066_s12 }
  0x4d   :  { %2189 = vmatpush3.msra.mxu0 %v113_v3  ;;  %2201 = vmatprep.subr.mxu1 %v2619_v4  ;;  %s2493_s13 = scalar_lea.vmem %s2067_s12, 256  ;;  %p2498_p3 = scmp.lt.s32.totalorder %s2067_s12, %s2067_s12 }
  0x4e   :  { %2190 = vmatprep.subr.mxu0 %v112_v5  ;;  %2202 = vmatpush3.msra.mxu1 %v2619_v4  ;;  %p2494_p2 = scmp.ne.s32.totalorder %s2067_s12, %s2493_s13  ;;  %p2499_p4 = scmp.lt.s32.totalorder %s2493_s13, %s2493_s13 }
  0x4f   :  { %2191 = vmatpush3.msra.mxu0 %v112_v5  ;;  %2203 = vmatprep.subr.mxu1 %v2623_v6 }
  0x50   :  { %2192 = vmatprep.subr.mxu0 %v111_v7  ;;  %2204 = vmatpush3.msra.mxu1 %v2623_v6  ;;  %p2500_p5 = por %p2499_p4, %p2498_p3 }
  0x51   :  { %2205 = vmatprep.mubr.msk.f32.mxu1 %vm115_vm0, %v197_v8  ;;  %2193 = vmatpush3.msra.mxu0 %v111_v7 }
  0x52   :  { %2194 = vmatprep.mubr.msk.f32.mxu0 %vm115_vm0, %v109_v9  ;;  %2206 = vmatmul.mubr.msk.f32.vlgmr.msra.gmra.mxu1 %vm115_vm0, %v198_v10  ;;  %p2501_p6 = pnand %p2500_p5, %p2494_p2 }
  0x53   :  { %2195 = vmatmul.mubr.msk.f32.vlgmr.msra.gmra.mxu0 %vm115_vm0, %v110_v11  ;;  %2213 = vmatprep.subr.mxu1 %v2531_v12 }
  0x54   :  { %2208 = vmatprep.subr.mxu0 %v2531_v12  ;;  %2215 = vmatprep.mubr.msk.f32.mxu1 %vm2532_vm1, %v2531_v12 }
  0x55   :  { %2210 = vmatprep.mubr.msk.f32.mxu0 %vm2532_vm1, %v2531_v12 }
 0x112   :  { %v2639_v13 = vpop.f32.mrf.mxu1 }
 0x113   :  { %542 = vrot.lane.b32.xlu1 %v2639_v13, %s2533_s4  ;;  %v2643_v14 = vpop.f32.mrf.mxu0  ;;  %2214 = vmatpush3.xpose.msk.msra.mxu1 %vm284_vm2, %v2639_v13 }
 0x114   :  { %v2647_v15 = vpop.f32.mrf.mxu1  ;;  %2223 = vmatprep.subr.mxu1 %v2531_v12 }
 0x115   :  { %2209 = vmatpush3.xpose.msk.msra.mxu0 %vm284_vm2, %v2647_v15  ;;  %v2655_v16 = vpop.f32.mrf.mxu0 }
 0x116   :  { %2216 = vmatmul.mubr.msk.f32.vlgmr.msra.gmra.mxu1 %vm284_vm2, %v2643_v14  ;;  %2218 = vmatprep.subr.mxu0 %v2531_v12 }
 0x117   :  { %622 = vrot.lane.b32.xlu1 %v2647_v15, %s2534_s5  ;;  %2225 = vmatprep.mubr.msk.f32.mxu1 %vm2532_vm1, %v2531_v12 }
 0x118   :  { %2211 = vmatmul.mubr.msk.f32.vlgmr.msra.gmra.mxu0 %vm284_vm2, %v2655_v16 }
 0x119   :  { %2220 = vmatprep.mubr.msk.f32.mxu0 %vm2532_vm1, %v2531_v12 }
 0x185   :  { %v543_v17 = vpop.permute.xlu1 %542 }
 0x186   :  { %2224 = vmatpush3.msra.mxu1 %v543_v17 }
 0x187   :  { %2233 = vmatprep.subr.mxu1 %v2531_v12 }
 0x189   :  { %v623_v35 = vpop.permute.xlu1 %622 }
 0x1d6   :  { %v433_v18 = vpop.f32.mrf.mxu1 }
 0x1d7   :  { %v441_v23 = vsel %vm437_vm3, %v433_v18, -inf }
 0x1d8   :  { %v357_v19 = vpop.f32.mrf.mxu0  ;;  %v2217_v20 = vpop.f32.mrf.mxu1 }
 0x1d9   :  { %v438_v21 = vsel %vm437_vm3, %v357_v19, -inf }
 0x1da   :  { %439 = vmax.xlane.f32.xlu0 %v438_v21  ;;  %v2212_v22 = vpop.f32.mrf.mxu0 }
 0x1de   :  { %442 = vmax.xlane.f32.xlu0 %v441_v23 }
 0x1f4   :  { %466 = vrot.lane.b32.xlu0 %v2647_v15, %s2533_s4 }
 0x1f8   :  { %620 = vrot.lane.b32.xlu0 %v2655_v16, %s2534_s5 }
 0x263   :  { %v440_v24 = vpop.xlane.xlu0 %439 }
 0x264   :  { %v444_v25 = vsub.f32 %v357_v19, %v440_v24 }
 0x266   :  { %v446_v28 = vmul.f32 1.442695, %v444_v25 }
 0x267   :  { %v443_v26 = vpop.xlane.xlu0 %442 }
 0x268   :  { %v445_v27 = vsub.f32 %v433_v18, %v443_v26 }
 0x26a   :  { %v448_v29 = vmul.f32 1.442695, %v445_v27 }
 0x26b   :  { %v467_v30 = vpop.permute.xlu0 %466 }
 0x26c   :  { %2341 = vpow2.f32 %v448_v29  ;;  %2219 = vmatpush3.msra.mxu0 %v467_v30  ;;  %v618_v29 = vld [vmem:[#allocation11] sm:$0xff]  ;;  %v958_v30 = vld [vmem:[#allocation11 + $0x18] sm:$0xff] }
 0x26d   :  { %2228 = vmatprep.subr.mxu0 %v2531_v12  ;;  %2343 = vpow2.f32 %v446_v28 }
 0x26f   :  { %v621_v50 = vpop.permute.xlu0 %620 }
 0x279   :  { %v2342_v31 = vpop.eup %2341 }
 0x27a   :  { %v453_v32 = vsel %vm437_vm3, %v2342_v31, 0.0  ;;  %v2344_v33 = vpop.eup %2343 }
 0x27b   :  { %454 = vadd.xlane.f32.xlu1 %v453_v32  ;;  %v450_v34 = vsel %vm437_vm3, %v2344_v33, 0.0 }
 0x27f   :  { %451 = vadd.xlane.f32.xlu1 %v450_v34  ;;  %v1121_v34 = vld [vmem:[#allocation2] sm:$0xff] }
 0x290   :  { %700 = vrot.lane.b32.xlu1 %v2639_v13, %s2534_s5 }
 0x294   :  { %698 = vrot.lane.b32.xlu1 %v2643_v14, %s2534_s5 }
 0x304   :  { %v455_v36 = vpop.xlane.xlu1 %454 }
 0x305   :  { %2345 = vrcp.f32 %v455_v36 }
 0x308   :  { %v452_v37 = vpop.xlane.xlu1 %451 }
 0x309   :  { %2347 = vrcp.f32 %v452_v37 }
 0x30c   :  { %v701_v44 = vpop.permute.xlu1 %700 }
 0x310   :  { %v699_v49 = vpop.permute.xlu1 %698 }
 0x312   :  { %v2346_v38 = vpop.eup %2345 }
 0x313   :  { %v459_v39 = vmul.f32 %v2346_v38, %v455_v36 }
 0x315   :  { %v461_v40 = vsub.f32 2.0, %v459_v39 }
 0x316   :  { %v2348_v41 = vpop.eup %2347 }
 0x317   :  { %v463_v42 = vmul.f32 %v2346_v38, %v461_v40  ;;  %v458_v43 = vmul.f32 %v2348_v41, %v452_v37  ;;  %v1122_v37 = vld [vmem:[#allocation2 + $0x8] sm:$0xff] }
 0x319   :  { %v465_v45 = vmul.f32 %v2342_v31, %v463_v42  ;;  %v460_v46 = vsub.f32 2.0, %v458_v43  ;;  %v957_v31 = vld [vmem:[#allocation11 + $0x10] sm:$0xff] }
 0x31b   :  { %v462_v47 = vmul.f32 %v2348_v41, %v460_v46  ;;  %2226 = vmatmul.mubr.msk.f32.vlgmr.msra.gmra.mxu1 %vm437_vm3, %v465_v45 }
 0x31c   :  { %2234 = vmatpush3.xpose.msk.msra.mxu1 %vm284_vm2, %v701_v44  ;;  %2235 = vmatprep.mubr.msk.f32.mxu1 %vm2532_vm1, %v2531_v12 }
 0x31d   :  { %v464_v48 = vmul.f32 %v2344_v33, %v462_v47  ;;  %2243 = vmatprep.subr.mxu1 %v2531_v12 }
 0x31f   :  { %2221 = vmatmul.mubr.msk.f32.vlgmr.msra.gmra.mxu0 %vm437_vm3, %v464_v48  ;;  %2236 = vmatmul.mubr.msk.f32.vlgmr.msra.gmra.mxu1 %vm284_vm2, %v699_v49 }
 0x320   :  { %2229 = vmatpush3.xpose.msk.msra.mxu0 %vm284_vm2, %v623_v35  ;;  %2230 = vmatprep.mubr.msk.f32.mxu0 %vm2532_vm1, %v2531_v12 }
 0x321   :  { %2238 = vmatprep.subr.mxu0 %v2531_v12  ;;  %2245 = vmatprep.mubr.msk.f32.mxu1 %vm2532_vm1, %v2531_v12 }
 0x323   :  { %2231 = vmatmul.mubr.msk.f32.vlgmr.msra.gmra.mxu0 %vm284_vm2, %v621_v50 }
 0x324   :  { %2240 = vmatprep.mubr.msk.f32.mxu0 %vm2532_vm1, %v2531_v12 }
 0x3db   :  { %v614_v51 = vpop.f32.mrf.mxu1 }
 0x3dd   :  { %v2227_v52 = vpop.f32.mrf.mxu1 }
 0x3df   :  { %v538_v53 = vpop.f32.mrf.mxu0  ;;  %v772_v54 = vpop.f32.mrf.mxu1 }
 0x3e0   :  { %v779_v55 = vsel %vm437_vm3, %v772_v54, -inf }
 0x3e1   :  { %780 = vmax.xlane.f32.xlu1 %v779_v55  ;;  %v2222_v56 = vpop.f32.mrf.mxu0  ;;  %v2237_v57 = vpop.f32.mrf.mxu1 }
 0x3e3   :  { %v694_v58 = vpop.f32.mrf.mxu0 }
 0x3e4   :  { %v776_v59 = vsel %vm437_vm3, %v694_v58, -inf }
 0x3e5   :  { %777 = vmax.xlane.f32.xlu0 %v776_v59  ;;  %v2232_v60 = vpop.f32.mrf.mxu0 }
 0x3f2   :  { %880 = vrot.lane.b32.xlu1 %v2639_v13, %s2535_s8  ;;  %v619_v13 = vld [vmem:[#allocation11 + $0x8] sm:$0xff] }
 0x3f6   :  { %1208 = vrot.lane.b32.xlu1 %v2655_v16, %s2533_s4 }
 0x3fa   :  { %1285 = vrot.lane.b32.xlu1 %v2643_v14, %s2533_s4 }
 0x46a   :  { %v781_v61 = vpop.xlane.xlu1 %780 }
 0x46b   :  { %v783_v62 = vsub.f32 %v772_v54, %v781_v61 }
 0x46d   :  { %v786_v5 = vmul.f32 1.442695, %v783_v62 }
 0x46e   :  { %v881_v63 = vpop.permute.xlu1 %880  ;;  %v778_v1 = vpop.xlane.xlu0 %777 }
 0x46f   :  { %v782_v3 = vsub.f32 %v694_v58, %v778_v1  ;;  %2244 = vmatpush3.msra.mxu1 %v881_v63 }
 0x470   :  { %2255 = vmatprep.subr.mxu1 %v619_v13 }
 0x471   :  { %v784_v7 = vmul.f32 1.442695, %v782_v3 }
 0x473   :  { %2349 = vpow2.f32 %v784_v7 }
 0x474   :  { %2351 = vpow2.f32 %v786_v5 }
 0x480   :  { %v2350_v8 = vpop.eup %2349 }
 0x481   :  { %v788_v9 = vsel %vm437_vm3, %v2350_v8, 0.0  ;;  %v2352_v10 = vpop.eup %2351 }
 0x482   :  { %789 = vadd.xlane.f32.xlu0 %v788_v9  ;;  %v791_v11 = vsel %vm437_vm3, %v2352_v10, 0.0 }
 0x486   :  { %792 = vadd.xlane.f32.xlu0 %v791_v11 }
 0x49c   :  { %804 = vrot.lane.b32.xlu0 %v2647_v15, %s2535_s8 }
 0x50b   :  { %v790_v17 = vpop.xlane.xlu0 %789 }
 0x50c   :  { %2353 = vrcp.f32 %v790_v17 }
 0x50f   :  { %v793_v18 = vpop.xlane.xlu0 %792 }
 0x510   :  { %2355 = vrcp.f32 %v793_v18 }
 0x513   :  { %v805_v19 = vpop.permute.xlu0 %804 }
 0x514   :  { %2239 = vmatpush3.msra.mxu0 %v805_v19 }
 0x515   :  { %2248 = vmatprep.subr.mxu0 %v958_v30 }
 0x519   :  { %v2354_v20 = vpop.eup %2353 }
 0x51a   :  { %v796_v21 = vmul.f32 %v2354_v20, %v790_v17  ;;  %v1543_v17 = vld [vmem:[#allocation11 + $0x20] sm:$0xff] }
 0x51c   :  { %v798_v22 = vsub.f32 2.0, %v796_v21 }
 0x51d   :  { %v2356_v23 = vpop.eup %2355 }
 0x51e   :  { %v800_v24 = vmul.f32 %v2354_v20, %v798_v22  ;;  %v797_v25 = vmul.f32 %v2356_v23, %v793_v18 }
 0x520   :  { %v802_v26 = vmul.f32 %v2350_v8, %v800_v24  ;;  %v799_v27 = vsub.f32 2.0, %v797_v25 }
 0x522   :  { %v801_v28 = vmul.f32 %v2356_v23, %v799_v27  ;;  %2241 = vmatmul.mubr.msk.f32.vlgmr.msra.gmra.mxu0 %vm437_vm3, %v802_v26 }
 0x523   :  { %2249 = vmatpush3.msra.mxu0 %v958_v30 }
 0x524   :  { %v803_v15 = vmul.f32 %v2352_v10, %v801_v28  ;;  %2250 = vmatprep.subr.mxu0 %v957_v31 }
 0x525   :  { %2251 = vmatpush3.msra.mxu0 %v957_v31 }
 0x526   :  { %2246 = vmatmul.mubr.msk.f32.vlgmr.msra.gmra.mxu1 %vm437_vm3, %v803_v15  ;;  %2262 = vmatprep.subr.mxu0 %v2613_v0 }
 0x527   :  { %2256 = vmatpush3.msra.mxu1 %v619_v13  ;;  %2259 = vmatprep.mubr.msk.f32.mxu1 %vm284_vm2, %v538_v53  ;;  %v1544_v13 = vld [vmem:[#allocation11 + $0x28] sm:$0xff] }
 0x528   :  { %2257 = vmatprep.subr.mxu1 %v618_v29 }
 0x529   :  { %2258 = vmatpush3.msra.mxu1 %v618_v29 }
 0x52a   :  { %2260 = vmatmul.mubr.msk.f32.vlgmr.msra.gmra.mxu1 %vm284_vm2, %v614_v51  ;;  %2273 = vmatprep.subr.mxu1 %v2531_v12 }
 0x52b   :  { %2275 = vmatprep.mubr.msk.f32.mxu1 %vm2532_vm1, %v2531_v12 }
 0x5e2   :  { %v876_v32 = vpop.f32.mrf.mxu0 }
 0x5e3   :  { %2252 = vmatprep.mubr.msk.f32.mxu0 %vm284_vm2, %v876_v32 }
 0x5e4   :  { %v2242_v33 = vpop.f32.mrf.mxu0 }
 0x5e6   :  { %v952_v35 = vpop.f32.mrf.mxu1 }
 0x5e7   :  { %2253 = vmatmul.mubr.msk.f32.vlgmr.msra.gmra.mxu0 %vm284_vm2, %v952_v35 }
 0x5e8   :  { %2263 = vmatpush3.msra.mxu0 %v2613_v0  ;;  %v2247_v36 = vpop.f32.mrf.mxu1  ;;  %2270 = vmatprep.mubr.msk.f32.mxu0 %vm115_vm0, %v1121_v34 }
 0x5e9   :  { %2264 = vmatprep.subr.mxu0 %v2615_v2 }
 0x5ea   :  { %2265 = vmatpush3.msra.mxu0 %v2615_v2  ;;  %v2749_v40 = vpop.f32.mrf.mxu1 }
 0x5eb   :  { %2266 = vmatprep.subr.mxu0 %v2619_v4 }
 0x5ec   :  { %2267 = vmatpush3.msra.mxu0 %v2619_v4  ;;  %v1209_v4 = vpop.permute.xlu1 %1208  ;;  %v2751_v41 = vpop.f32.mrf.mxu1 }
 0x5ed   :  { %2268 = vmatprep.subr.mxu0 %v2623_v6 }
 0x5ee   :  { %2269 = vmatpush3.msra.mxu0 %v2623_v6 }
 0x5ef   :  { %2271 = vmatmul.mubr.msk.f32.vlgmr.msra.gmra.mxu0 %vm115_vm0, %v1122_v37  ;;  %2283 = vmatprep.subr.mxu0 %v2531_v12 }
 0x5f0   :  { %2285 = vmatprep.mubr.msk.f32.mxu0 %vm2532_vm1, %v2531_v12  ;;  %v1286_v6 = vpop.permute.xlu1 %1285 }
 0x6a7   :  { %v2729_v0 = vpop.f32.mrf.mxu0 }
 0x6a8   :  { %v1118_v31 = vadd.f32 %v2749_v40, %v2729_v0 }
 0x6a9   :  { %v2731_v38 = vpop.f32.mrf.mxu0 }
 0x6aa   :  { %v1113_v33 = vadd.f32 %v2751_v41, %v2731_v38 }
 0x6af   :  { %v2733_v2 = vpop.f32.mrf.mxu0 }
 0x6b1   :  { %v2735_v39 = vpop.f32.mrf.mxu0 }
 0x6b2   :  { %2274 = vmatpush3.xpose.msk.msra.mxu1 %vm284_vm2, %v2735_v39 }
 0x6b3   :  { %2278 = vmatprep.subr.mxu1 %v2531_v12 }
 0x6b5   :  { %2276 = vmatmul.mubr.msk.f32.vlgmr.msra.gmra.mxu1 %vm284_vm2, %v1209_v4 }
 0x6b6   :  { %2279 = vmatpush3.xpose.msk.msra.mxu1 %vm284_vm2, %v2733_v2  ;;  %2280 = vmatprep.mubr.msk.f32.mxu1 %vm2532_vm1, %v2531_v12 }
 0x6b7   :  { %2288 = vmatprep.subr.mxu1 %v2531_v12 }
 0x6b9   :  { %2281 = vmatmul.mubr.msk.f32.vlgmr.msra.gmra.mxu1 %vm284_vm2, %v1286_v6 }
 0x6ba   :  { %2290 = vmatprep.mubr.msk.f32.mxu1 %vm2532_vm1, %v2531_v12 }
 0x775   :  { %v1281_v42 = vpop.f32.mrf.mxu1 }
 0x776   :  { %v1362_v43 = vsel %vm437_vm3, %v1281_v42, -inf }
 0x777   :  { %1363 = vmax.xlane.f32.xlu0 %v1362_v43  ;;  %v2277_v44 = vpop.f32.mrf.mxu1 }
 0x779   :  { %v1358_v45 = vpop.f32.mrf.mxu1 }
 0x77a   :  { %v1365_v46 = vsel %vm437_vm3, %v1358_v45, -inf }
 0x77b   :  { %1366 = vmax.xlane.f32.xlu1 %v1365_v46  ;;  %v2282_v47 = vpop.f32.mrf.mxu1 }
 0x78c   :  { %1466 = vrot.lane.b32.xlu1 %v2733_v2, %s2533_s4 }
 0x790   :  { %1630 = vrot.lane.b32.xlu1 %v2735_v39, %s2534_s5 }
 0x794   :  { %1708 = vrot.lane.b32.xlu1 %v2733_v2, %s2534_s5 }
 0x798   :  { %1706 = vrot.lane.b32.xlu1 %v2643_v14, %s2535_s8 }
 0x800   :  { %v1364_v48 = vpop.xlane.xlu0 %1363 }
 0x801   :  { %v1368_v49 = vsub.f32 %v1281_v42, %v1364_v48 }
 0x803   :  { %v1370_v50 = vmul.f32 1.442695, %v1368_v49 }
 0x804   :  { %v1367_v51 = vpop.xlane.xlu1 %1366 }
 0x805   :  { %2357 = vpow2.f32 %v1370_v50  ;;  %v1369_v52 = vsub.f32 %v1358_v45, %v1367_v51 }
 0x807   :  { %v1372_v53 = vmul.f32 1.442695, %v1369_v52 }
 0x808   :  { %v1467_v54 = vpop.permute.xlu1 %1466 }
 0x809   :  { %2359 = vpow2.f32 %v1372_v53  ;;  %2289 = vmatpush3.msra.mxu1 %v1467_v54 }
 0x80a   :  { %2300 = vmatprep.subr.mxu1 %v2531_v12 }
 0x80c   :  { %v1631_v11 = vpop.permute.xlu1 %1630 }
 0x810   :  { %v1709_v19 = vpop.permute.xlu1 %1708 }
 0x812   :  { %v2358_v55 = vpop.eup %2357 }
 0x813   :  { %v1374_v56 = vsel %vm437_vm3, %v2358_v55, 0.0 }
 0x814   :  { %1375 = vadd.xlane.f32.xlu0 %v1374_v56  ;;  %v1707_v23 = vpop.permute.xlu1 %1706 }
 0x816   :  { %v2360_v57 = vpop.eup %2359 }
 0x817   :  { %v1377_v58 = vsel %vm437_vm3, %v2360_v57, 0.0 }
 0x818   :  { %1378 = vadd.xlane.f32.xlu0 %v1377_v58 }
 0x82e   :  { %1390 = vrot.lane.b32.xlu0 %v2735_v39, %s2533_s4 }
 0x832   :  { %1628 = vrot.lane.b32.xlu0 %v2655_v16, %s2535_s8 }
 0x89d   :  { %v1376_v14 = vpop.xlane.xlu0 %1375 }
 0x89e   :  { %2361 = vrcp.f32 %v1376_v14 }
 0x8a1   :  { %v1379_v59 = vpop.xlane.xlu0 %1378 }
 0x8a2   :  { %2363 = vrcp.f32 %v1379_v59 }
 0x8a5   :  { %v1391_v60 = vpop.permute.xlu0 %1390 }
 0x8a6   :  { %2284 = vmatpush3.msra.mxu0 %v1391_v60  ;;  %v2119_v60 = vld [vmem:[%s2822_s6] ss:$0 sm:$0xff] }
 0x8a7   :  { %2293 = vmatprep.subr.mxu0 %v1544_v13 }
 0x8a9   :  { %v1629_v16 = vpop.permute.xlu0 %1628 }
 0x8ab   :  { %v2362_v61 = vpop.eup %2361 }
 0x8ac   :  { %v1382_v62 = vmul.f32 %v2362_v61, %v1376_v14 }
 0x8ae   :  { %v1384_v63 = vsub.f32 2.0, %v1382_v62 }
 0x8af   :  { %v2364_v1 = vpop.eup %2363 }
 0x8b0   :  { %v1386_v3 = vmul.f32 %v2362_v61, %v1384_v63  ;;  %v1383_v5 = vmul.f32 %v2364_v1, %v1379_v59 }
 0x8b2   :  { %v1388_v7 = vmul.f32 %v2358_v55, %v1386_v3  ;;  %v1385_v8 = vsub.f32 2.0, %v1383_v5  ;;  %v1965_v55 = vld [vmem:[#allocation11 + $0x30] sm:$0xff] }
 0x8b4   :  { %v1387_v9 = vmul.f32 %v2364_v1, %v1385_v8  ;;  %2286 = vmatmul.mubr.msk.f32.vlgmr.msra.gmra.mxu0 %vm437_vm3, %v1388_v7 }
 0x8b5   :  { %2294 = vmatpush3.msra.mxu0 %v1544_v13 }
 0x8b6   :  { %v1389_v10 = vmul.f32 %v2360_v57, %v1387_v9  ;;  %2295 = vmatprep.subr.mxu0 %v1543_v17 }
 0x8b7   :  { %2296 = vmatpush3.msra.mxu0 %v1543_v17 }
 0x8b8   :  { %2291 = vmatmul.mubr.msk.f32.vlgmr.msra.gmra.mxu1 %vm437_vm3, %v1389_v10  ;;  %2305 = vmatprep.subr.mxu0 %v2531_v12 }
 0x8b9   :  { %2301 = vmatpush3.xpose.msk.msra.mxu1 %vm284_vm2, %v1631_v11  ;;  %2302 = vmatprep.mubr.msk.f32.mxu1 %vm2532_vm1, %v2531_v12 }
 0x8ba   :  { %2310 = vmatprep.subr.mxu1 %v2531_v12 }
 0x8bc   :  { %2303 = vmatmul.mubr.msk.f32.vlgmr.msra.gmra.mxu1 %vm284_vm2, %v1629_v16 }
 0x8bd   :  { %2312 = vmatprep.mubr.msk.f32.mxu1 %vm2532_vm1, %v2531_v12 }
 0x974   :  { %v1462_v18 = vpop.f32.mrf.mxu0 }
 0x975   :  { %2297 = vmatprep.mubr.msk.f32.mxu0 %vm284_vm2, %v1462_v18 }
 0x976   :  { %v2287_v20 = vpop.f32.mrf.mxu0 }
 0x978   :  { %v1538_v21 = vpop.f32.mrf.mxu1 }
 0x979   :  { %2298 = vmatmul.mubr.msk.f32.vlgmr.msra.gmra.mxu0 %vm284_vm2, %v1538_v21 }
 0x97a   :  { %2306 = vmatpush3.xpose.msk.msra.mxu0 %vm284_vm2, %v1709_v19  ;;  %v2292_v22 = vpop.f32.mrf.mxu1  ;;  %2307 = vmatprep.mubr.msk.f32.mxu0 %vm2532_vm1, %v2531_v12 }
 0x97b   :  { %2315 = vmatprep.subr.mxu0 %v2531_v12 }
 0x97c   :  { %v1702_v24 = vpop.f32.mrf.mxu1 }
 0x97d   :  { %2308 = vmatmul.mubr.msk.f32.vlgmr.msra.gmra.mxu0 %vm284_vm2, %v1707_v23  ;;  %v1784_v25 = vsel %vm437_vm3, %v1702_v24, -inf }
 0x97e   :  { %1785 = vmax.xlane.f32.xlu0 %v1784_v25  ;;  %v2304_v26 = vpop.f32.mrf.mxu1  ;;  %2317 = vmatprep.mubr.msk.f32.mxu0 %vm2532_vm1, %v2531_v12 }
 0xa07   :  { %v1786_v27 = vpop.xlane.xlu0 %1785 }
 0xa08   :  { %v1790_v28 = vsub.f32 %v1702_v24, %v1786_v27 }
 0xa0a   :  { %v1792_v15 = vmul.f32 1.442695, %v1790_v28 }
 0xa0c   :  { %2365 = vpow2.f32 %v1792_v15 }
 0xa19   :  { %v2366_v29 = vpop.eup %2365 }
 0xa1a   :  { %v1796_v30 = vsel %vm437_vm3, %v2366_v29, 0.0 }
 0xa1b   :  { %1797 = vadd.xlane.f32.xlu0 %v1796_v30 }
 0xa39   :  { %v2299_v32 = vpop.f32.mrf.mxu0 }
 0xa3a   :  { %v1627_v34 = vadd.f32 %v2299_v32, %v1118_v31 }
 0xa3b   :  { %v1617_v35 = vpop.f32.mrf.mxu0 }
 0xa3c   :  { %v1626_v36 = vadd.f32 %v1617_v35, %v1113_v33 }
 0xa3d   :  { %v1780_v37 = vpop.f32.mrf.mxu0 }
 0xa3e   :  { %v1787_v12 = vsel %vm437_vm3, %v1780_v37, -inf }
 0xa3f   :  { %1788 = vmax.xlane.f32.xlu1 %v1787_v12  ;;  %v2309_v4 = vpop.f32.mrf.mxu0 }
 0xa50   :  { %1888 = vrot.lane.b32.xlu1 %v2733_v2, %s2535_s8 }
 0xaa4   :  { %v1798_v40 = vpop.xlane.xlu0 %1797 }
 0xac8   :  { %v1789_v6 = vpop.xlane.xlu1 %1788 }
 0xac9   :  { %v1791_v42 = vsub.f32 %v1780_v37, %v1789_v6 }
 0xacb   :  { %v1794_v43 = vmul.f32 1.442695, %v1791_v42 }
 0xacc   :  { %v1889_v44 = vpop.permute.xlu1 %1888 }
 0xacd   :  { %2367 = vpow2.f32 %v1794_v43  ;;  %2316 = vmatpush3.msra.mxu0 %v1889_v44 }
 0xace   :  { %2369 = vrcp.f32 %v1798_v40 }
 0xada   :  { %v2368_v0 = vpop.eup %2367 }
 0xadb   :  { %v1799_v38 = vsel %vm437_vm3, %v2368_v0, 0.0  ;;  %v2370_v41 = vpop.eup %2369 }
 0xadc   :  { %1800 = vadd.xlane.f32.xlu0 %v1799_v38  ;;  %v1804_v45 = vmul.f32 %v2370_v41, %v1798_v40 }
 0xade   :  { %v1806_v46 = vsub.f32 2.0, %v1804_v45 }
 0xae0   :  { %v1808_v47 = vmul.f32 %v2370_v41, %v1806_v46 }
 0xae2   :  { %v1810_v48 = vmul.f32 %v2366_v29, %v1808_v47 }
 0xaf2   :  { %1812 = vrot.lane.b32.xlu0 %v2735_v39, %s2535_s8  ;;  %v1966_v39 = vld [vmem:[#allocation11 + $0x38] sm:$0xff] }
 0xb65   :  { %v1801_v2 = vpop.xlane.xlu0 %1800 }
 0xb66   :  { %2371 = vrcp.f32 %v1801_v2 }
 0xb69   :  { %v1813_v49 = vpop.permute.xlu0 %1812 }
 0xb6a   :  { %2311 = vmatpush3.msra.mxu1 %v1813_v49 }
 0xb6b   :  { %2313 = vmatmul.mubr.msk.f32.vlgmr.msra.gmra.mxu1 %vm437_vm3, %v1810_v48  ;;  %2320 = vmatprep.subr.mxu1 %v1966_v39 }
 0xb6c   :  { %2321 = vmatpush3.msra.mxu1 %v1966_v39 }
 0xb6d   :  { %2322 = vmatprep.subr.mxu1 %v1965_v55 }
 0xb6e   :  { %2323 = vmatpush3.msra.mxu1 %v1965_v55 }
 0xb73   :  { %v2372_v50 = vpop.eup %2371 }
 0xb74   :  { %v1805_v51 = vmul.f32 %v2372_v50, %v1801_v2 }
 0xb76   :  { %v1807_v52 = vsub.f32 2.0, %v1805_v51 }
 0xb78   :  { %v1809_v53 = vmul.f32 %v2372_v50, %v1807_v52 }
 0xb7a   :  { %v1811_v54 = vmul.f32 %v2368_v0, %v1809_v53 }
 0xb7c   :  { %2318 = vmatmul.mubr.msk.f32.vlgmr.msra.gmra.mxu0 %vm437_vm3, %v1811_v54 }
 0xc2b   :  { %v1884_v56 = vpop.f32.mrf.mxu1 }
 0xc2c   :  { %2324 = vmatprep.mubr.msk.f32.mxu1 %vm284_vm2, %v1884_v56 }
 0xc2d   :  { %v2314_v57 = vpop.f32.mrf.mxu1 }
 0xc3c   :  { %v1960_v58 = vpop.f32.mrf.mxu0 }
 0xc3d   :  { %2325 = vmatmul.mubr.msk.f32.vlgmr.msra.gmra.mxu1 %vm284_vm2, %v1960_v58 }
 0xc3e   :  { %v2319_v14 = vpop.f32.mrf.mxu0 }
 0xcfd   :  { %v2326_v59 = vpop.f32.mrf.mxu1 }
 0xcfe   :  { %v2049_v61 = vadd.f32 %v2326_v59, %v1627_v34 }
 0xcff   :  { %v2039_v62 = vpop.f32.mrf.mxu1 }
 0xd00   :  { %v2058_v63 = vadd.f32 %v2119_v60, %v2049_v61  ;;  %v2048_v1 = vadd.f32 %v2039_v62, %v1626_v36 }
 0xd02   :  { %2060 = vst.msk [vmem:[#allocation13 + $0x8] sm:$0xff] %vm115_vm0, %v2058_v63  ;;  %v2057_v3 = vadd.f32 %v2119_v60, %v2048_v1 }
 0xd04   :  { %2059 = vst.msk [vmem:[#allocation13] sm:$0xff] %vm115_vm0, %v2057_v3 }
 0xd05   :  { %2504 = shalt.err (!%p2501_p6)
}
 0xd06   :  { %2072 = dma.vmem_to_hbm [thread:$0]  %s2067_s12, 256, %s2823_s7, [#allocation4], %s2525_s29, %s2525_s29, %s2526_s30  }
 0xd07   :  { %2521 = dma.done.wait [#allocation4], 256  }
 0xd08   :  { %2522 = vsyncadd [#allocation4], 4294967040 }
 0xd09   :  { %2076 = vsyncpa [#allocation3], 1 }
 0xd0a   :  { %2077 = vsyncpa [#allocation6], 1 }
 0xd0b   :  { %2078 = vsyncpa [#allocation9], 1 }
 0xd0c   :  { %2079 = vsyncpa [#allocation12], 1 }
 0xd0d   :  { %2080 = vsyncpa [#allocation4], 1 }

</bundles_post_ra>
